<compile_context>
chip_gen: v7x
topology: tpu7x:2x2x1
jax: 0.10.0
libtpu: 0.0.40
codegen_flags: <defaults>
</compile_context>

<pallas_src>
import math
import functools

import jax
import jax.numpy as jnp
from jax import lax
from jax.experimental import pallas as pl
from jax.experimental.pallas import tpu as pltpu


def _sdpa_kernel(q_ref, k_ref, v_ref, mask_ref, ctx_ref, attn_ref, *, d_k, mxu_dtype):
    scale = 1.0 / math.sqrt(d_k)

    # Fold 1/sqrt(d_k) into Q (scale [TQ, D] instead of the [TQ, S] scores).
    q = (q_ref[0].astype(jnp.float32) * scale).astype(mxu_dtype)   # [TQ, D]
    k = k_ref[0].astype(mxu_dtype)                                 # [S,  D]
    v = v_ref[0].astype(mxu_dtype)                                 # [S,  D]
    mask = mask_ref[0]                                             # [TQ, S] int8

    # scores = (Q / sqrt(d_k)) @ K^T : contract the last axis of both operands
    # -> feeds the MXU directly, no materialized transpose of K.
    scores = lax.dot_general(
        q, k,
        dimension_numbers=(((1,), (1,)), ((), ())),
        preferred_element_type=jnp.float32)                        # [TQ, S] f32

    # masked_fill_(attn_mask, -1e9)
    scores = jnp.where(mask != 0, jnp.float32(-1.0e9), scores)

    # Numerically stable softmax, kept in f32 (VPU/EUP).
    m = jnp.max(scores, axis=-1, keepdims=True)
    e = jnp.exp(scores - m)
    denom = jnp.sum(e, axis=-1, keepdims=True)
    # attn is an exposed output compared at tight tolerance -> exact reciprocal
    # (approx=True would be the free EUP path if bit-tightness is not needed).
    attn = e * pl.reciprocal(denom, approx=False)                  # [TQ, S] f32

    # context = attn @ V (MXU, f32 accumulation; operands optionally bf16).
    ctx = lax.dot_general(
        attn.astype(mxu_dtype), v,
        dimension_numbers=(((1,), (0,)), ((), ())),
        preferred_element_type=jnp.float32)                        # [TQ, D] f32

    ctx_ref[0] = ctx.astype(ctx_ref.dtype)
    attn_ref[0] = attn.astype(attn_ref.dtype)


def scaled_dot_product_attention(Q, K, V, attn_mask, *, q_tile=128, mxu_dtype=None):
    """Q, K, V: [BH, S, D].  attn_mask: [BH, S, S] (True/nonzero = masked).

    mxu_dtype: dtype used for the MXU matmul operands (accumulation is always
    f32).  Default keeps the input dtype (exact); jnp.bfloat16 enables the
    v6e/v7x fast MXU path.
    """
    BH, S, D = Q.shape
    assert K.shape == (BH, S, D) and V.shape == (BH, S, D)
    assert attn_mask.shape == (BH, S, S)

    if mxu_dtype is None:
        mxu_dtype = Q.dtype

    # int8 mask: same information, 4x less HBM DMA and VMEM residency.
    mask_i8 = attn_mask.astype(jnp.int8)

    # Query-tile size: bounds per-step VMEM to O(TQ*S) (instead of O(S*S)).
    # Fall back to the full S when S is small or not 128-divisible so block
    # dims are either (8,128)-divisible or equal to the full array dims.
    tq = q_tile if (S % q_tile == 0 and S > q_tile) else S
    num_q = S // tq

    kernel = functools.partial(_sdpa_kernel, d_k=D, mxu_dtype=mxu_dtype)

    # Rough double-buffered working set, used to size scoped VMEM explicitly.
    # Capped at 64 MiB so the same choice is safe on v7x (64 MiB physical).
    bytes_per_step = 2 * (            # 2x for double buffering
        tq * D * 4                    # Q tile
        + 2 * S * D * 4               # K, V (resident across q tiles)
        + tq * S * 1                  # mask tile (int8)
        + tq * D * 4                  # ctx tile
        + tq * S * 4                  # attn tile (f32)
    )
    vmem_limit = int(min(max(bytes_per_step + (4 << 20), 32 << 20), 64 << 20))

    ctx, attn = pl.pallas_call(
        kernel,
        out_shape=(
            jax.ShapeDtypeStruct((BH, S, D), Q.dtype),      # context
            jax.ShapeDtypeStruct((BH, S, S), jnp.float32),  # attn
        ),
        grid_spec=pltpu.PrefetchScalarGridSpec(
            num_scalar_prefetch=0,
            grid=(BH, num_q),
            in_specs=[
                pl.BlockSpec((1, tq, D), lambda b, qi: (b, qi, 0)),  # Q tile
                pl.BlockSpec((1, S, D), lambda b, qi: (b, 0, 0)),    # K (resident)
                pl.BlockSpec((1, S, D), lambda b, qi: (b, 0, 0)),    # V (resident)
                pl.BlockSpec((1, tq, S), lambda b, qi: (b, qi, 0)),  # mask tile
            ],
            out_specs=[
                pl.BlockSpec((1, tq, D), lambda b, qi: (b, qi, 0)),  # context
                pl.BlockSpec((1, tq, S), lambda b, qi: (b, qi, 0)),  # attn
            ],
        ),
        compiler_params=pltpu.CompilerParams(
            dimension_semantics=("parallel", "parallel"),
            vmem_limit_bytes=vmem_limit,
        ),
    )(Q, K, V, mask_i8)
    return ctx, attn


def _reference(Q, K, V, attn_mask):
    d_k = Q.shape[-1]
    scores = jnp.einsum("bqd,bkd->bqk", Q, K) / jnp.sqrt(jnp.float32(d_k))
    scores = jnp.where(attn_mask, -1.0e9, scores)
    attn = jax.nn.softmax(scores, axis=-1)
    ctx = jnp.einsum("bqk,bkd->bqd", attn, V)
    return ctx, attn


if __name__ == "__main__":
    key = jax.random.PRNGKey(0)
    batch, heads, seq, d_k = 2, 2, 8, 32
    BH = batch * heads

    kq, kk, kv, km = jax.random.split(key, 4)
    Q = jax.random.normal(kq, (BH, seq, d_k), dtype=jnp.float32)
    K = jax.random.normal(kk, (BH, seq, d_k), dtype=jnp.float32)
    V = jax.random.normal(kv, (BH, seq, d_k), dtype=jnp.float32)
    # Random mask (True = masked), like a padding/causal mask.
    attn_mask = jax.random.bernoulli(km, p=0.2, shape=(BH, seq, seq))

    # Exact path (f32 MXU operands): must match the reference tightly.
    ctx, attn = scaled_dot_product_attention(Q, K, V, attn_mask)
    jax.block_until_ready((ctx, attn))

    ctx_ref, attn_ref = _reference(Q, K, V, attn_mask)
    assert jnp.allclose(ctx, ctx_ref, atol=1e-5, rtol=1e-5), "context mismatch"
    assert jnp.allclose(attn, attn_ref, atol=1e-5, rtol=1e-5), "attn mismatch"

    # bf16-MXU fast path (v6e/v7x): softmax stays f32, looser tolerance.
    ctx_b, attn_b = scaled_dot_product_attention(
        Q, K, V, attn_mask, mxu_dtype=jnp.bfloat16)
    jax.block_until_ready((ctx_b, attn_b))
    assert jnp.allclose(ctx_b, ctx_ref, atol=1e-1, rtol=1e-1), "bf16 context mismatch"
    assert jnp.allclose(attn_b, attn_ref, atol=1e-1, rtol=1e-1), "bf16 attn mismatch"

    print("KERNEL_OK")
</pallas_src>

<mosaic_0001>
module attributes {stable_mosaic.version = 11 : i64} {
  func.func @_sdpa_kernel(%arg0: i32, %arg1: i32, %arg2: memref<1x8x32xf32, #tpu.memory_space<vmem>>, %arg3: memref<1x8x32xf32, #tpu.memory_space<vmem>>, %arg4: memref<1x8x32xf32, #tpu.memory_space<vmem>>, %arg5: memref<1x8x8xi8, #tpu.memory_space<vmem>>, %arg6: memref<1x8x32xf32, #tpu.memory_space<vmem>>, %arg7: memref<1x8x8xf32, #tpu.memory_space<vmem>>) attributes {dimension_semantics = [#tpu.dimension_semantics<parallel>, #tpu.dimension_semantics<parallel>], iteration_bounds = array<i64: 4, 1>, scalar_prefetch = 0 : i64, scratch_operands = 0 : i64, tpu.core_type = #tpu.core_type<tc>, window_params = [{transform_indices = @transform_0, window_bounds = array<i64: 1, 8, 32>}, {transform_indices = @transform_1, window_bounds = array<i64: 1, 8, 32>}, {transform_indices = @transform_2, window_bounds = array<i64: 1, 8, 32>}, {transform_indices = @transform_3, window_bounds = array<i64: 1, 8, 8>}, {transform_indices = @transform_4, window_bounds = array<i64: 1, 8, 32>}, {transform_indices = @transform_5, window_bounds = array<i64: 1, 8, 8>}]} {
    %c0 = arith.constant 0 : index
    %c0_0 = arith.constant 0 : index
    %c0_1 = arith.constant 0 : index
    %0 = vector.load %arg2[%c0, %c0_0, %c0_1] : memref<1x8x32xf32, #tpu.memory_space<vmem>>, vector<1x8x32xf32>
    %1 = vector.shape_cast %0 : vector<1x8x32xf32> to vector<8x32xf32>
    %cst = arith.constant 0.176776692 : f32
    %2 = vector.broadcast %cst : f32 to vector<8x32xf32>
    %3 = arith.mulf %1, %2 : vector<8x32xf32>
    %c0_2 = arith.constant 0 : index
    %c0_3 = arith.constant 0 : index
    %c0_4 = arith.constant 0 : index
    %4 = vector.load %arg3[%c0_2, %c0_3, %c0_4] : memref<1x8x32xf32, #tpu.memory_space<vmem>>, vector<1x8x32xf32>
    %5 = vector.shape_cast %4 : vector<1x8x32xf32> to vector<8x32xf32>
    %c0_5 = arith.constant 0 : index
    %c0_6 = arith.constant 0 : index
    %c0_7 = arith.constant 0 : index
    %6 = vector.load %arg4[%c0_5, %c0_6, %c0_7] : memref<1x8x32xf32, #tpu.memory_space<vmem>>, vector<1x8x32xf32>
    %7 = vector.shape_cast %6 : vector<1x8x32xf32> to vector<8x32xf32>
    %c0_8 = arith.constant 0 : index
    %c0_9 = arith.constant 0 : index
    %c0_10 = arith.constant 0 : index
    %8 = vector.load %arg5[%c0_8, %c0_9, %c0_10] : memref<1x8x8xi8, #tpu.memory_space<vmem>>, vector<1x8x8xi8>
    %9 = vector.shape_cast %8 : vector<1x8x8xi8> to vector<8x8xi8>
    %cst_11 = arith.constant dense<0.000000e+00> : vector<8x8xf32>
    %10 = tpu.matmul %3, %5, %cst_11 {dimension_numbers = #tpu.dot_dimension_numbers<[1], [1], [0], [0], [0, 0, 1, 0], [], []>} : vector<8x32xf32>, vector<8x32xf32>, vector<8x8xf32> -> vector<8x8xf32>
    %c0_i8 = arith.constant 0 : i8
    %11 = vector.broadcast %c0_i8 : i8 to vector<8x8xi8>
    %12 = arith.cmpi ne, %9, %11 : vector<8x8xi8>
    %cst_12 = arith.constant -1.000000e+09 : f32
    %13 = vector.broadcast %cst_12 : f32 to vector<8x8xf32>
    %14 = arith.select %12, %13, %10 : vector<8x8xi1>, vector<8x8xf32>
    %cst_13 = arith.constant dense<0xFF800000> : vector<8xf32>
    %15 = vector.multi_reduction <maximumf>, %14, %cst_13 [1] : vector<8x8xf32> to vector<8xf32>
    %16 = vector.shape_cast %15 : vector<8xf32> to vector<8x1xf32>
    %17 = vector.broadcast %16 : vector<8x1xf32> to vector<8x8xf32>
    %18 = arith.subf %14, %17 : vector<8x8xf32>
    %19 = math.exp %18 : vector<8x8xf32>
    %cst_14 = arith.constant dense<0.000000e+00> : vector<8xf32>
    %20 = vector.multi_reduction <add>, %19, %cst_14 [1] : vector<8x8xf32> to vector<8xf32>
    %21 = vector.shape_cast %20 : vector<8xf32> to vector<8x1xf32>
    %22 = tpu.reciprocal %21 : vector<8x1xf32> -> vector<8x1xf32>
    %23 = vector.broadcast %22 : vector<8x1xf32> to vector<8x8xf32>
    %24 = arith.mulf %19, %23 : vector<8x8xf32>
    %cst_15 = arith.constant dense<0.000000e+00> : vector<8x32xf32>
    %25 = tpu.matmul %24, %7, %cst_15 {dimension_numbers = #tpu.dot_dimension_numbers<[1], [0], [0], [1], [0, 0, 1, 1], [], []>} : vector<8x8xf32>, vector<8x32xf32>, vector<8x32xf32> -> vector<8x32xf32>
    %c0_16 = arith.constant 0 : index
    %c0_17 = arith.constant 0 : index
    %c0_18 = arith.constant 0 : index
    %26 = vector.load %arg6[%c0_16, %c0_17, %c0_18] : memref<1x8x32xf32, #tpu.memory_space<vmem>>, vector<1x8x32xf32>
    %27 = vector.shape_cast %26 : vector<1x8x32xf32> to vector<8x32xf32>
    %28 = vector.shape_cast %25 : vector<8x32xf32> to vector<1x8x32xf32>
    tpu.vector_store %arg6[%c0_16, %c0_17, %c0_18], %28 {strides = array<i32>} : memref<1x8x32xf32, #tpu.memory_space<vmem>>, vector<1x8x32xf32>,
    %c0_19 = arith.constant 0 : index
    %c0_20 = arith.constant 0 : index
    %c0_21 = arith.constant 0 : index
    %29 = vector.load %arg7[%c0_19, %c0_20, %c0_21] : memref<1x8x8xf32, #tpu.memory_space<vmem>>, vector<1x8x8xf32>
    %30 = vector.shape_cast %29 : vector<1x8x8xf32> to vector<8x8xf32>
    %31 = vector.shape_cast %24 : vector<8x8xf32> to vector<1x8x8xf32>
    tpu.vector_store %arg7[%c0_19, %c0_20, %c0_21], %31 {strides = array<i32>} : memref<1x8x8xf32, #tpu.memory_space<vmem>>, vector<1x8x8xf32>,
    return
  }
  func.func @transform_0(%arg0: i32, %arg1: i32) -> (i32, i32, i32) {
    %c0_i32 = arith.constant 0 : i32
    %c0_i32_0 = arith.constant 0 : i32
    return %arg0, %arg1, %c0_i32 : i32, i32, i32
  }
  func.func @transform_1(%arg0: i32, %arg1: i32) -> (i32, i32, i32) {
    %c0_i32 = arith.constant 0 : i32
    %c0_i32_0 = arith.constant 0 : i32
    %c0_i32_1 = arith.constant 0 : i32
    return %arg0, %c0_i32, %c0_i32_0 : i32, i32, i32
  }
  func.func @transform_2(%arg0: i32, %arg1: i32) -> (i32, i32, i32) {
    %c0_i32 = arith.constant 0 : i32
    %c0_i32_0 = arith.constant 0 : i32
    %c0_i32_1 = arith.constant 0 : i32
    return %arg0, %c0_i32, %c0_i32_0 : i32, i32, i32
  }
  func.func @transform_3(%arg0: i32, %arg1: i32) -> (i32, i32, i32) {
    %c0_i32 = arith.constant 0 : i32
    %c0_i32_0 = arith.constant 0 : i32
    return %arg0, %arg1, %c0_i32 : i32, i32, i32
  }
  func.func @transform_4(%arg0: i32, %arg1: i32) -> (i32, i32, i32) {
    %c0_i32 = arith.constant 0 : i32
    %c0_i32_0 = arith.constant 0 : i32
    return %arg0, %arg1, %c0_i32 : i32, i32, i32
  }
  func.func @transform_5(%arg0: i32, %arg1: i32) -> (i32, i32, i32) {
    %c0_i32 = arith.constant 0 : i32
    %c0_i32_0 = arith.constant 0 : i32
    return %arg0, %arg1, %c0_i32 : i32, i32, i32
  }
}

</mosaic_0001>

<bundles_post_ra>
// kernel: tpu_custom_call.1
= control target key start
LH: loop header
LB: loop body
LE: loop exit
PB: predicated region body
PF: predicated region fallthrough
CT: control target
= control target key end

     0   :  { %s1424_s0 = inlined_call_operand.hbm [shape: f32[4,8,32], index: 0, kind: input, shape index: {}]   ;;  %s1425_s1 = inlined_call_operand.hbm [shape: f32[4,8,32], index: 1, kind: input, shape index: {}]   ;;  %s1426_s2 = inlined_call_operand.hbm [shape: f32[4,8,32], index: 2, kind: input, shape index: {}]   ;;  %s1427_s3 = inlined_call_operand.vmem [shape: s8[4,8,8], index: 3, kind: input, shape index: {}]   ;;  %s1428_s4 = inlined_call_operand.hbm [shape: f32[4,8,32], index: 4, kind: output, shape index: {0}]   ;;  %s1429_s5 = inlined_call_operand.hbm [shape: f32[4,8,8], index: 5, kind: output, shape index: {1}]  }
   0x1   :  { %1438 = sst [smem:[#allocation20_spill]] %s1425_s1 }
   0x2   :  { %11 = vsyncpa [#allocation3], 0 }
   0x3   :  { %13 = vsyncpa [#allocation3 + $0x1], 0 }
   0x4   :  { %14 = vsyncpa [#allocation6], 0 }
   0x5   :  { %16 = vsyncpa [#allocation6 + $0x1], 0 }
   0x6   :  { %17 = vsyncpa [#allocation4], 0 }
   0x7   :  { %19 = vsyncpa [#allocation4 + $0x1], 0 }
   0x8   :  { %20 = vsyncpa [#allocation10], 0 }
   0x9   :  { %22 = vsyncpa [#allocation10 + $0x1], 0  ;;  %s1122_s18 = smov 0   ;;  %s1124_s19 = smov 0  }
   0xa   :  { %s1126_s20 = smov 0   ;;  %s1128_s21 = smov 0  }
   0xb   :  { %s1130_s22 = smov 0   ;;  %s1132_s23 = smov 0  }
   0xc LB: > { %1439 = sst [smem:[#allocation15_spill]] %s1062_s18  ;;  %s1153_s24 = sadd.s32 4294967295, %s1082_s23   ;;  %s1082_s23 = sphi %s1132_s23, %s28_s23   ;;  %s1078_s22 = sphi %s1130_s22, %s1464_s22   ;;  %s1074_s21 = sphi %s1128_s21, %s1463_s21   ;;  %s1070_s20 = sphi %s1126_s20, %s1467_s20   ;;  %s1066_s19 = sphi %s1124_s19, %s1466_s19   ;;  %s1062_s18 = sphi %s1122_s18, %s1465_s18  }
   0xd   : > { %1440 = sst [smem:[#allocation16_spill]] %s1078_s22  ;;  %s751_s25 = sadd.s32 4294967294, %s1082_s23  }
   0xe   : > { %s40_s26 = sadd.s32 1, %s1078_s22  ;;  %s49_s27 = sadd.s32 1, %s1070_s20 }
   0xf   : > { %p42_p0 = scmp.ge.s32.totalorder %s40_s26, 4  ;;  %p56_p1 = scmp.ne.s32.totalorder %s1070_s20, %s1066_s19 }
  0x10   : > { %p57_p2 = scmp.eq.s32.totalorder %s1082_s23, 0  ;;  %p62_p3 = scmp.ne.s32.totalorder %s1066_s19, %s1062_s18 }
  0x11   : > { %s1469_s26 = smov (%p42_p0, %s40_s26), 0  ;;  %p63_p5 = scmp.eq.s32.totalorder %s1153_s24, 0 }
  0x12   : > { %1441 = sst [smem:[#allocation17_spill]] %s1469_s26  ;;  %p1165_p4 = por %p57_p2, %p56_p1 }
  0x13   : > { %s44_s29 = ssub.s32 %s1078_s22, %s1469_s26  ;;  %p168_p6 = scmp.eq.s32.totalorder %s1153_s24, 3 }
  0x14   : > { %p47_p7 = scmp.eq.s32.totalorder %s44_s29, 0  ;;  %p1173_p8 = por %p63_p5, %p62_p3 }
  0x15   : > { %p1177_p9 = por %p168_p6, %p56_p1  ;;  %p174_p10 = scmp.eq.s32.totalorder %s751_s25, 3 }
  0x16   : > { %s1443_s30 = scalar_select %p1173_p8, 1, 0 }
  0x17   : > { %s1444_s6 = scalar_select %p1177_p9, 1, 0 }
  0x18   : > { %s1182_s7 = scalar_select %p47_p7, %s1070_s20, %s49_s27  }
  0x19   : > { %p1184_p11 = por %p174_p10, %p62_p3  ;;  %p817_p12 = scmp.lt.s32.totalorder %s1082_s23, 4 }
  0x1a   : > { %1445 = sst [smem:[#allocation18_spill]] %s1182_s7  ;;  %s1430_s9 = sand.u32 1, %s1070_s20  }
  0x1b   : > { %s1446_s8 = scalar_select %p1184_p11, 1, 0 }
  0x1c   : > { %s1192_s10 = sshll.u32 %s1430_s9, 3  ;;  %s1195_s11 = sshll.u32 %s1078_s22, 7 }
  0x1d   : > { %1447 = sst [smem:[#allocation19_spill]] %s1446_s8  ;;  %p1199_p13 = pnand %p817_p12, %p1165_p4 }
  0x1e   : > { %s241_s13 = sand.u32 1, %s1082_s23   ;;  %s1449_s1 = sld [smem:[#allocation20_spill]] }
  0x1f   : > { %s1448_s12 = scalar_select %p1199_p13, 1, 0 }
  0x20   : > { %s245_s17 = scalar_lea.vmem [#allocation5], %s1192_s10  ;;  %s1215_s27 = scalar_lea.sflag [#allocation6], %s241_s13 }
  0x21   : > { %s252_s25 = sshll.u32 %s245_s17, 4  ;;  %p1221_p3 = pneg %p1199_p13  ;;  %s1212_s25 = int_to_ptr.vmem [resolvable:$true] %s252_s25 }
  0x24   : > { %s1208_s16 = scalar_lea.hbm %s1449_s1, %s1195_s11  ;;  %s879_s17 = scalar_lea.hbm %s1449_s1, 512 }
  0x25   : > { %s874_s28 = scalar_lea.hbm %s1208_s16, 128  ;;  %p880_p6 = scmp.lt.u32.totalorder %s1208_s16, %s1449_s1 }
  0x26   : > { %p875_p2 = scmp.ne.s32.totalorder %s1208_s16, %s874_s28  ;;  %p881_p7 = scmp.lt.u32.totalorder %s879_s17, %s874_s28 }
  0x27   : > { %p883_p12 = scmp.lt.u32.totalorder %s874_s28, %s1208_s16 }
  0x28   : > { %p877_p4 = pnand %p1221_p3, %p875_p2  ;;  %p882_p10 = por %p881_p7, %p880_p6 }
  0x2a   : > { %p878_p5 = pneg %p877_p4  ;;  %p884_p0 = por %p883_p12, %p882_p10 }
  0x2c   : > { %p885_p1 = pnand %p884_p0, %p878_p5 }
  0x2e   : > { %888 = shalt.err (!%p885_p1)
}
  0x2f   : > { %s889_s13 = scalar_lea.vmem %s1212_s25, 128  ;;  %s1084_s14 = smov [#allocation5]  }
  0x30   : > { %p890_p2 = scmp.ne.s32.totalorder %s1212_s25, %s889_s13  ;;  %s894_s15 = sshll.u32 %s1084_s14, 4  ;;  %s895_s15 = int_to_ptr.vmem [resolvable:$false] %s894_s15 }
  0x31   : > { %s896_s26 = scalar_lea.vmem %s895_s15, 256  ;;  %p897_p9 = scmp.lt.s32.totalorder %s1212_s25, %s895_s15 }
  0x32   : > { %p892_p4 = pnand %p890_p2, %p1221_p3  ;;  %p898_p8 = scmp.lt.s32.totalorder %s896_s26, %s889_s13 }
  0x34   : > { %p893_p11 = pneg %p892_p4  ;;  %p899_p6 = por %p898_p8, %p897_p9 }
  0x36   : > { %p900_p7 = pnand %p899_p6, %p893_p11 }
  0x38   : > { %903 = shalt.err (!%p900_p7)
}
  0x39   : > { %806 = dma.hbm_to_vmem [thread:$0]  (!%p1199_p13), %s1208_s16, 128, %s1212_s25, %s1215_s27  }
  0x3a   : > { %p1451_p0 = scmp.lt.s32.totalorder %s1082_s23, 5  ;;  %p1452_p1 = scmp.ge.s32.totalorder %s1082_s23, 1 }
  0x3b   : > { %s1257_s13 = scalar_lea.hbm %s1424_s0, %s1195_s11  ;;  %s226_s14 = scalar_lea.vmem [#allocation2], %s1192_s10 }
  0x3c   : > { %p1249_p5 = pnand %p1452_p1, %p1451_p0  ;;  %s234_s15 = sshll.u32 %s226_s14, 4  ;;  %s1260_s15 = int_to_ptr.vmem [resolvable:$true] %s234_s15 }
  0x3d   : > { %s1266_s26 = scalar_lea.hbm %s1426_s2, %s1195_s11  ;;  %s1454_s1 = sand.u32 1, %s1070_s20  }
  0x3e   : > { %s1453_s9 = scalar_select %p1249_p5, 1, 0 }
  0x3f   : > { %s223_s22 = scalar_lea.sflag [#allocation3], %s1454_s1  ;;  %s904_s7 = scalar_lea.hbm %s1257_s13, 128 }
  0x40   : > { %p905_p8 = scmp.ne.s32.totalorder %s1257_s13, %s904_s7  ;;  %s909_s8 = scalar_lea.hbm %s1424_s0, 512 }
  0x41   : > { %p910_p10 = scmp.lt.u32.totalorder %s1257_s13, %s1424_s0  ;;  %p911_p12 = scmp.lt.u32.totalorder %s909_s8, %s904_s7 }
  0x42   : > { %p907_p9 = pnand %p905_p8, %p1221_p3  ;;  %p913_p4 = scmp.lt.u32.totalorder %s904_s7, %s1257_s13 }
  0x43   : > { %p912_p2 = por %p911_p12, %p910_p10 }
  0x44   : > { %p908_p11 = pneg %p907_p9 }
  0x45   : > { %p914_p6 = por %p913_p4, %p912_p2 }
  0x47   : > { %p915_p7 = pnand %p914_p6, %p908_p11 }
  0x49   : > { %918 = shalt.err (!%p915_p7)
}
  0x4a   : > { %s919_s1 = scalar_lea.vmem %s1260_s15, 128  ;;  %s1085_s11 = smov [#allocation2]  }
  0x4b   : > { %p920_p0 = scmp.ne.s32.totalorder %s1260_s15, %s919_s1  ;;  %s924_s16 = sshll.u32 %s1085_s11, 4  ;;  %s925_s16 = int_to_ptr.vmem [resolvable:$false] %s924_s16 }
  0x4c   : > { %s926_s18 = scalar_lea.vmem %s925_s16, 256  ;;  %p927_p9 = scmp.lt.s32.totalorder %s1260_s15, %s925_s16 }
  0x4d   : > { %p922_p1 = pnand %p920_p0, %p1221_p3  ;;  %p928_p5 = scmp.lt.s32.totalorder %s926_s18, %s919_s1 }
  0x4f   : > { %p923_p8 = pneg %p922_p1  ;;  %p929_p10 = por %p928_p5, %p927_p9 }
  0x51   : > { %p930_p12 = pnand %p929_p10, %p923_p8 }
  0x53   : > { %933 = shalt.err (!%p930_p12)
}
  0x54   : > { %803 = dma.hbm_to_vmem [thread:$0]  (!%p1199_p13), %s1257_s13, 128, %s1260_s15, %s223_s22  }
  0x55   : > { %s263_s7 = scalar_lea.vmem [#allocation7], %s1192_s10  ;;  %s934_s25 = scalar_lea.hbm %s1266_s26, 128 }
  0x56   : > { %s270_s8 = sshll.u32 %s263_s7, 4  ;;  %p935_p11 = scmp.ne.s32.totalorder %s1266_s26, %s934_s25  ;;  %s271_s8 = int_to_ptr.vmem [resolvable:$true] %s270_s8 }
  0x57   : > { %s939_s14 = scalar_lea.hbm %s1426_s2, 512  ;;  %p940_p4 = scmp.lt.u32.totalorder %s1266_s26, %s1426_s2 }
  0x58   : > { %p937_p5 = pnand %p935_p11, %p1221_p3  ;;  %p941_p6 = scmp.lt.u32.totalorder %s939_s14, %s934_s25 }
  0x59   : > { %p943_p0 = scmp.lt.u32.totalorder %s934_s25, %s1266_s26 }
  0x5a   : > { %p938_p2 = pneg %p937_p5  ;;  %p942_p7 = por %p941_p6, %p940_p4 }
  0x5c   : > { %p944_p1 = por %p943_p0, %p942_p7 }
  0x5e   : > { %p945_p8 = pnand %p944_p1, %p938_p2 }
  0x60   : > { %948 = shalt.err (!%p945_p8)
}
  0x61   : > { %s949_s22 = scalar_lea.vmem %s271_s8, 128  ;;  %s1086_s10 = smov [#allocation7]  }
  0x62   : > { %p950_p9 = scmp.ne.s32.totalorder %s271_s8, %s949_s22  ;;  %s954_s13 = sshll.u32 %s1086_s10, 4  ;;  %s955_s13 = int_to_ptr.vmem [resolvable:$false] %s954_s13 }
  0x63   : > { %s956_s15 = scalar_lea.vmem %s955_s13, 256  ;;  %p957_p11 = scmp.lt.s32.totalorder %s271_s8, %s955_s13 }
  0x64   : > { %p952_p10 = pnand %p950_p9, %p1221_p3  ;;  %p958_p5 = scmp.lt.s32.totalorder %s956_s15, %s949_s22 }
  0x66   : > { %p953_p12 = pneg %p952_p10  ;;  %p959_p13 = por %p958_p5, %p957_p11 }
  0x68   : > { %p960_p4 = pnand %p959_p13, %p953_p12 }
  0x6a   : > { %963 = shalt.err (!%p960_p4)
}
  0x6b   : > { %p1455_p6 = scmp.ne.s32.totalorder %s1448_s12, 0  ;;  %p1456_p2 = scmp.ne.s32.totalorder %s1453_s9, 0 }
  0x6c   : > { %s1313_s29 = sand.u32 (!%p1456_p2), 1, %s1066_s19   ;;  %p1457_p13 = scmp.ne.s32.totalorder (!%p1456_p2), %s1443_s30, 0 }
  0x6d   : > { %809 = dma.hbm_to_vmem [thread:$0]  (!%p1455_p6), %s1266_s26, 128, %s271_s8, %s1215_s27  }
  0x6e   : > { %289 = sbr.rel (%p1456_p2) target bundleno = 880 (0x370), region = 36  ;;  %s1316_s16 = sshll.u32 (!%p1456_p2), %s1313_s29, 3 }
  0x6f   : > { %s292_s18 = scalar_lea.sflag (!%p1456_p2), [#allocation3], %s1313_s29  ;;  %s295_s7 = scalar_lea.vmem (!%p1456_p2), [#allocation2], %s1316_s16 }
  0x75   : > { %1045 = dma.done.wait (%p1457_p13), %s292_s18, 128  }
  0x76   : > { %1047 = vsyncadd (%p1457_p13), %s292_s18, 4294967168  ;;  %s300_s12 = sand.u32 1, %s1153_s24   ;;  %s304_s9 = scalar_lea.vmem [#allocation5], %s1316_s16 }
  0x77   : > { %s301_s27 = scalar_lea.sflag [#allocation6], %s300_s12 }
  0x78   : > { %1049 = dma.done.wait (%p1457_p13), %s301_s27, 256  }
  0x79   : > { %1051 = vsyncadd (%p1457_p13), %s301_s27, 4294967040  ;;  %v1087_v0 = vmov 0.0   ;;  %vm1088_vm0 = vmmov 0   ;;  %vm376_vm1 = vcmask 261120   ;;  %v373_v1 = vld [vmem:[%s304_s9] sm:$0xff]  ;;  %v371_v2 = vld [vmem:[%s295_s7] sm:$0xff] }
  0x7a   : > { %780 = vmatprep.subr.mxu0 %v1087_v0  ;;  %782 = vmatprep.mubr.msk.f32.mxu0 %vm1088_vm0, %v1087_v0  ;;  %v372_v3 = vmul.f32 0.17677669, %v371_v2  ;;  %p362_p3 = scmp.lt.s32.totalorder %s1074_s21, 3  ;;  %v1089_v5 = vmov 0   ;;  %vm458_vm4 = vcmask 64512   ;;  %s313_s28 = scalar_lea.vmem [#allocation7], %s1316_s16 }
  0x7b   : > { %785 = vmatprep.subr.mxu1 %v1087_v0  ;;  %787 = vmatprep.mubr.msk.f32.mxu1 %vm1088_vm0, %v1087_v0  ;;  %v374_v17 = vld [vmem:[%s313_s28] sm:$0xff]  ;;  %s361_s17 = scalar_lea.vmem [#allocation9], %s1316_s16  ;;  %s772_s14 = sshll.u32 %s1074_s21, 7 }
  0x7c   : > { %781 = vmatpush3.xpose.msk.msra.mxu0 %vm376_vm1, %v373_v1  ;;  %s363_s24 = scalar_select %p362_p3, %s1074_s21, 3  ;;  %786 = vmatpush3.msra.mxu1 %v374_v17 }
  0x7d   : > { %s1349_s22 = scalar_lea.hbm %s1429_s5, %s772_s14  ;;  %s579_s10 = sshll.u32 %s361_s17, 4  ;;  %s580_s10 = int_to_ptr.vmem [resolvable:$true] %s579_s10 }
  0x7e   : > { %s766_s30 = sshll.u32 %s363_s24, 1  ;;  %s551_s13 = scalar_lea.sflag [#allocation10], %s1313_s29 }
  0x7f   : > { %783 = vmatmul.mubr.msk.f32.vlgmr.msra.gmra.mrb[0].mxu0 %vm376_vm1, %v372_v3  ;;  %s368_s25 = scalar_lea.vmem %s1427_s3, %s766_s30  ;;  %s964_s15 = scalar_lea.vmem %s580_s10, 128 }
  0x80   : > { %v375_v4 = vld [vmem:[%s368_s25] sm:$0x3]  ;;  %p965_p7 = scmp.ne.s32.totalorder %s580_s10, %s964_s15  ;;  %p1458_p0 = scmp.ne.s32.totalorder %s1444_s6, 0 }
  0x81   : > { %vm453_vm2 = vnez %v375_v4  ;;  %s1090_s18 = smov [#allocation9]  }
  0x82   : > { %v454_v6 = vsel %vm453_vm2, 16843009, %v1089_v5  ;;  %p966_p1 = pnand %p965_p7, %p1458_p0  ;;  %s968_s7 = sshll.u32 %s1090_s18, 4  ;;  %s969_s7 = int_to_ptr.vmem [resolvable:$false] %s968_s7 }
  0x83   : > { %v455_v7 = vunpack.c.0.s8 %v454_v6  ;;  %s970_s12 = scalar_lea.vmem %s969_s7, 256  ;;  %p971_p9 = scmp.lt.s32.totalorder %s580_s10, %s969_s7 }
  0x84   : > { %p967_p8 = pneg %p966_p1  ;;  %p972_p10 = scmp.lt.s32.totalorder %s970_s12, %s964_s15 }
  0x85   : > { %vm456_vm3 = vcmp.ne.s32.totalorder %v455_v7, 0 }
  0x86   : > { %p973_p12 = por %p972_p10, %p971_p9 }
  0x88   : > { %p974_p11 = pnand %p973_p12, %p967_p8 }
 0x152   : > { %v449_v8 = vpop.f32.mrb[0].mxu0 }
 0x153   : > { %v457_v9 = vsel %vm456_vm3, -1e+09, %v449_v8  ;;  %v784_v10 = vpop.f32.mrb[1].mxu0 }
 0x154   : > { %v459_v11 = vsel %vm458_vm4, %v457_v9, -inf }
 0x155   : > { %460 = vmax.xlane.f32.xlu0 %v459_v11 }
 0x1e2   : > { %v461_v12 = vpop.xlane.xlu0 %460 }
 0x1e3   : > { %v462_v13 = vsub.f32 %v457_v9, %v461_v12 }
 0x1e5   : > { %v463_v14 = vmul.f32 1.442695, %v462_v13 }
 0x1e7   : > { %870 = vpow2.f32 %v463_v14 }
 0x1f1   : > { %v871_v15 = vpop.eup %870 }
 0x1f2   : > { %v465_v16 = vsel %vm458_vm4, %v871_v15, 0.0 }
 0x1f3   : > { %466 = vadd.xlane.f32.xlu0 %v465_v16 }
 0x280   : > { %v467_v18 = vpop.xlane.xlu0 %466 }
 0x281   : > { %872 = vrcp.f32 %v467_v18 }
 0x28b   : > { %v873_v19 = vpop.eup %872 }
 0x28c   : > { %v469_v20 = vmul.f32 %v873_v19, %v871_v15 }
 0x28e   : > { %788 = vmatmul.mubr.msk.f32.vlgmr.msra.gmra.mrb[0].mxu1 %vm458_vm4, %v469_v20  ;;  %544 = vst.msk [vmem:[%s361_s17] sm:$0xff] %vm458_vm4, %v469_v20 }
 0x28f   : > { %977 = shalt.err (!%p974_p11)
}
 0x290   : > { %s978_s27 = scalar_lea.hbm %s1349_s22, 128  ;;  %s982_s30 = scalar_lea.hbm %s1429_s5, 512 }
 0x291   : > { %p979_p5 = scmp.ne.s32.totalorder %s1349_s22, %s978_s27  ;;  %p983_p2 = scmp.lt.u32.totalorder %s1349_s22, %s1429_s5 }
 0x292   : > { %p984_p13 = scmp.lt.u32.totalorder %s982_s30, %s978_s27  ;;  %p986_p7 = scmp.lt.u32.totalorder %s978_s27, %s1349_s22 }
 0x293   : > { %p980_p4 = pnand %p979_p5, %p1458_p0 }
 0x294   : > { %p985_p3 = por %p984_p13, %p983_p2 }
 0x295   : > { %p981_p6 = pneg %p980_p4 }
 0x296   : > { %p987_p1 = por %p986_p7, %p985_p3 }
 0x298   : > { %p988_p8 = pnand %p987_p1, %p981_p6 }
 0x29a   : > { %991 = shalt.err (!%p988_p8)
}
 0x29b   : > { %797 = dma.vmem_to_hbm [thread:$0]  (%p1458_p0), %s580_s10, 128, %s1349_s22, %s551_s13  }
 0x29c   : > { %s354_s25 = scalar_lea.vmem [#allocation8], %s1316_s16  ;;  %s1375_s11 = scalar_lea.hbm %s1428_s4, %s772_s14 }
 0x29d   : > { %s565_s28 = sshll.u32 %s354_s25, 4  ;;  %s546_s15 = scalar_lea.sflag [#allocation4], %s1313_s29  ;;  %s1377_s28 = int_to_ptr.vmem [resolvable:$true] %s565_s28 }
 0x29e   : > { %s992_s18 = scalar_lea.vmem %s1377_s28, 128  ;;  %s1091_s21 = smov [#allocation8]  }
 0x29f   : > { %p993_p9 = scmp.ne.s32.totalorder %s1377_s28, %s992_s18  ;;  %s996_s16 = sshll.u32 %s1091_s21, 4  ;;  %s997_s16 = int_to_ptr.vmem [resolvable:$false] %s996_s16 }
 0x2a0   : > { %s998_s14 = scalar_lea.vmem %s997_s16, 256  ;;  %p999_p11 = scmp.lt.s32.totalorder %s1377_s28, %s997_s16 }
 0x2a1   : > { %p994_p10 = pnand %p993_p9, %p1458_p0  ;;  %p1000_p5 = scmp.lt.s32.totalorder %s998_s14, %s992_s18 }
 0x2a3   : > { %p995_p12 = pneg %p994_p10  ;;  %p1001_p4 = por %p1000_p5, %p999_p11 }
 0x2a5   : > { %p1002_p6 = pnand %p1001_p4, %p995_p12 }
 0x361   : > { %v539_v21 = vpop.f32.mrb[0].mxu1 }
 0x362   : > { %543 = vst.msk [vmem:[%s354_s25] sm:$0xff] %vm376_vm1, %v539_v21  ;;  %v789_v22 = vpop.f32.mrb[1].mxu1 }
 0x363   : > { %1005 = shalt.err (!%p1002_p6)
}
 0x364   : > { %s1006_s29 = scalar_lea.hbm %s1375_s11, 128  ;;  %s1010_s13 = scalar_lea.hbm %s1428_s4, 512 }
 0x365   : > { %p1007_p2 = scmp.ne.s32.totalorder %s1375_s11, %s1006_s29  ;;  %p1011_p7 = scmp.lt.u32.totalorder %s1375_s11, %s1428_s4 }
 0x366   : > { %p1012_p1 = scmp.lt.u32.totalorder %s1010_s13, %s1006_s29  ;;  %p1014_p9 = scmp.lt.u32.totalorder %s1006_s29, %s1375_s11 }
 0x367   : > { %p1008_p13 = pnand %p1007_p2, %p1458_p0 }
 0x368   : > { %p1013_p8 = por %p1012_p1, %p1011_p7 }
 0x369   : > { %p1009_p3 = pneg %p1008_p13 }
 0x36a   : > { %p1015_p10 = por %p1014_p9, %p1013_p8 }
 0x36c   : > { %p1016_p12 = pnand %p1015_p10, %p1009_p3 }
 0x36e   : > { %1019 = shalt.err (!%p1016_p12)
}
 0x36f   : > { %796 = dma.vmem_to_hbm [thread:$0]  (%p1458_p0), %s1377_s28, 128, %s1375_s11, %s546_s15  }
 0x370 PF: > { %s1459_s27 = sld [smem:[#allocation15_spill]]  ;;  %s1460_s9 = sld [smem:[#allocation19_spill]] }
 0x371   : > { %p818_p11 = scmp.ge.s32.totalorder %s1082_s23, 2 }
 0x376   : > { %s591_s24 = sand.u32 1, %s1459_s27   ;;  %p1461_p5 = scmp.ne.s32.totalorder %s1460_s9, 0 }
 0x377   : > { %s592_s30 = scalar_lea.sflag [#allocation4], %s591_s24 }
 0x378   : > { %p811_p4 = pnand %p818_p11, %p1461_p5 }
 0x37a   : > { %1053 = dma.done.wait (!%p811_p4), %s592_s30, 128  }
 0x37b   : > { %1055 = vsyncadd (!%p811_p4), %s592_s30, 4294967168  ;;  %s601_s26 = scalar_lea.sflag [#allocation10], %s591_s24 }
 0x37c   : > { %1057 = dma.done.wait (!%p811_p4), %s601_s26, 128  }
 0x37d   : > { %1059 = vsyncadd (!%p811_p4), %s601_s26, 4294967168  ;;  %s28_s23 = sadd.s32 1, %s1082_s23   ;;  %s1462_s6 = sld [smem:[#allocation18_spill]] }
 0x37e   : > { %p25_p6 = scmp.ge.s32.totalorder %s28_s23, 6   ;;  %s1463_s21 = sld [smem:[#allocation16_spill]] }
 0x37f   : > { %s1464_s22 = sld [smem:[#allocation17_spill]]  ;;  %s1465_s18 = smov %s1066_s19 }
 0x380   : > { %s1466_s19 = smov %s1070_s20  ;;  %27 = sbr.rel (!%p25_p6) target bundleno = 12 (0xc), region = 125 }
 0x383   : > { %s1467_s20 = smov %s1462_s6 }
 0x387   :  { %606 = vsyncpa [#allocation3], 1 }
 0x388   :  { %608 = vsyncpa [#allocation3 + $0x1], 1 }
 0x389   :  { %609 = vsyncpa [#allocation6], 1 }
 0x38a   :  { %611 = vsyncpa [#allocation6 + $0x1], 1 }
 0x38b   :  { %612 = vsyncpa [#allocation4], 1 }
 0x38c   :  { %614 = vsyncpa [#allocation4 + $0x1], 1 }
 0x38d   :  { %615 = vsyncpa [#allocation10], 1 }
 0x38e   :  { %617 = vsyncpa [#allocation10 + $0x1], 1 }

</bundles_post_ra>
